<compile_context>
chip_gen: v7x
topology: tpu7x:2x2x1
jax: 0.10.0
libtpu: 0.0.40
codegen_flags: <defaults>
</compile_context>

<pallas_src>
import functools
import math

import jax
import jax.numpy as jnp
from jax.experimental import pallas as pl
from jax.experimental.pallas import tpu as pltpu

f32 = jnp.float32
bf16 = jnp.bfloat16


def _round_up(x, m):
    return (x + m - 1) // m * m


def _tpu_vmem_bytes():
    """Physical VMEM per core; conservative fallback (v7x = 64 MiB)."""
    try:
        info = pltpu.get_tpu_info()
        v = getattr(info, "vmem_capacity_bytes", None)
        if v:
            return int(v)
    except Exception:
        pass
    return 64 * 2**20


def _vmem_limit(bytes_estimate, physical):
    # ~85% of physical VMEM: ~54 MiB on v7x, ~109 MiB on v5e/v6e.
    cap = int(physical * 0.85)
    return int(min(cap, max(32 * 2**20, 2 * bytes_estimate)))


def _resident_spec(block_shape, index_map):
    """BlockSpec for grid-constant operands (weights / biases): single-buffer
    them when the running JAX supports pipeline_mode, so they don't burn a
    second VMEM buffer."""
    if hasattr(pl, "Buffered"):
        try:
            return pl.BlockSpec(block_shape, index_map,
                                pipeline_mode=pl.Buffered(1))
        except TypeError:
            pass
    return pl.BlockSpec(block_shape, index_map)


# ---------------------------------------------------------------------------
# Kernel 1: fused QKV projection   qkv = x @ W_qkv + b_qkv   (bf16 out)
# ---------------------------------------------------------------------------
def qkv_proj_kernel(x_ref, w_ref, b_ref, o_ref):
    x = x_ref[...].astype(jnp.bfloat16)          # cast in-kernel (saves an HBM pass)
    y = jnp.dot(x, w_ref[...], preferred_element_type=jnp.float32)
    o_ref[...] = (y + b_ref[...]).astype(o_ref.dtype)


# ---------------------------------------------------------------------------
# Kernel 2: attention core, all heads of one batch per grid step.
#   scores = Q K^T + mask (scale folded into Q) ; ctx = exp(scores - max) @ V
#   normalized afterwards by the row-sum reciprocal (EUP).
# ---------------------------------------------------------------------------
def attention_kernel(q_ref, k_ref, v_ref, mask_ref, o_ref, *, num_heads):
    mask = mask_ref[0]                           # (1, S) additive key mask, f32
    dh = q_ref.shape[-1]
    for h in range(num_heads):                   # static unroll; nH is small
        q = q_ref[0, :, 0, h, :]                 # (S, dh) bf16, scale pre-folded
        k = k_ref[0, :, 0, h, :]
        v = v_ref[0, :, 0, h, :]
        s = jax.lax.dot_general(q, k, (((1,), (1,)), ((), ())),
                                preferred_element_type=jnp.float32)   # (S, S)
        s = s + mask
        m = jnp.max(s, axis=-1, keepdims=True)
        p = jnp.exp(s - m)                                            # f32 numerator
        denom = jnp.sum(p, axis=-1, keepdims=True)
        # attention dropout is identity at inference
        ctx = jnp.dot(p.astype(jnp.bfloat16), v,
                      preferred_element_type=jnp.float32)             # (S, dh)
        ctx = ctx * pl.reciprocal(denom, approx=True)  # deferred softmax norm (EUP)
        # lane slice of the merged-head (S, H) output slab
        o_ref[0, :, h * dh:(h + 1) * dh] = ctx.astype(o_ref.dtype)


# ---------------------------------------------------------------------------
# Kernel 3: BertSelfOutput  (dense -> dropout(identity) -> +residual -> LayerNorm)
# ---------------------------------------------------------------------------
def self_output_kernel(x_ref, res_ref, w_ref, b_ref, g_ref, beta_ref, o_ref, *, eps):
    y = jnp.dot(x_ref[...], w_ref[...], preferred_element_type=jnp.float32)
    y = y + b_ref[...] + res_ref[...]            # bias + residual, f32
    mean = jnp.mean(y, axis=-1, keepdims=True)
    c = y - mean
    var = jnp.mean(c * c, axis=-1, keepdims=True)
    o_ref[...] = (c * jax.lax.rsqrt(var + eps) * g_ref[...]
                  + beta_ref[...]).astype(o_ref.dtype)


# ---------------------------------------------------------------------------
# Wrapper
# ---------------------------------------------------------------------------
def bert_attention(hidden_states, attention_mask, params, *, num_heads,
                   eps=1e-12, tm=None):
    """BertAttention forward (eval mode).

    hidden_states:  [B, S, H] f32
    attention_mask: key-only additive mask, shape [B, S] or [B, 1, 1, S]
    params: wq/wk/wv/wo [H, H] stored [in, out] (transposed from PyTorch),
            bq/bk/bv/bo [H], ln_gamma/ln_beta [H]
    returns: attention_output [B, S, H]
    """
    B, S, H = hidden_states.shape
    assert H % num_heads == 0
    nH = num_heads
    dh = H // nH
    scale = 1.0 / math.sqrt(dh)
    M = B * S

    if attention_mask.size != B * S:
        # TODO(synk): full per-query [B,1,S,S] masks are not supported.
        raise NotImplementedError(
            "only key-only additive masks ([B,S] / [B,1,1,S]) are supported")
    mask3d = attention_mask.astype(f32).reshape(B, 1, S)

    vmem_phys = _tpu_vmem_bytes()
    if tm is None:
        tm = 1024 if vmem_phys >= 100 * 2**20 else 512   # v5e/v6e : v7x
    tm_eff = M if M <= tm else tm                        # no explicit padding
    n_rows = pl.cdiv(M, tm_eff)                          # ragged last block is OK

    x2d = hidden_states.reshape(M, H)                    # f32; bf16 cast happens in-kernel

    # ---- 1) fused QKV projection (scale folded into query weights) ----------
    w_qkv = jnp.concatenate(
        [params["wq"] * scale, params["wk"], params["wv"]], axis=1).astype(bf16)
    b_qkv = jnp.concatenate(
        [params["bq"] * scale, params["bk"], params["bv"]]).astype(f32).reshape(1, 3 * H)

    est1 = (2 * (tm_eff * H * 4 + tm_eff * 3 * H * 2)    # double-buffered x / out
            + H * 3 * H * 2 + 3 * H * 4)                 # resident W_qkv + bias
    qkv = pl.pallas_call(
        qkv_proj_kernel,
        out_shape=jax.ShapeDtypeStruct((M, 3 * H), bf16),
        grid=(n_rows,),
        in_specs=[
            pl.BlockSpec((tm_eff, H), lambda i: (i, 0)),       # x tile (f32)
            _resident_spec((H, 3 * H), lambda i: (0, 0)),      # W_qkv resident (bf16)
            _resident_spec((1, 3 * H), lambda i: (0, 0)),      # bias
        ],
        out_specs=pl.BlockSpec((tm_eff, 3 * H), lambda i: (i, 0)),
        compiler_params=pltpu.CompilerParams(
            dimension_semantics=("parallel",),
            vmem_limit_bytes=_vmem_limit(est1, vmem_phys)),
        cost_estimate=pl.CostEstimate(
            flops=2 * M * H * 3 * H,
            transcendentals=0,
            bytes_accessed=M * H * 4 + H * 3 * H * 2 + 3 * H * 4 + M * 3 * H * 2),
    )(x2d, w_qkv, b_qkv)

    # Free metadata reshape: (M, 3H) -> (B, S, 3, nH, dh).  No XLA transpose.
    qkv5 = qkv.reshape(B, S, 3, nH, dh)

    # ---- 2) attention core: one grid step per batch, all heads inside -------
    qkv_blk = S * _round_up(nH, 16) * _round_up(dh, 128) * 2      # lane/sublane padded bf16
    est2 = (2 * 3 * qkv_blk                                       # q/k/v double-buffered
            + 2 * S * _round_up(H, 128) * 2                       # out slab (bf16)
            + 6 * S * S * 4 + 4 * S * 4)                          # softmax temporaries
    ctx = pl.pallas_call(
        functools.partial(attention_kernel, num_heads=nH),
        out_shape=jax.ShapeDtypeStruct((B, S, H), bf16),
        grid=(B,),
        in_specs=[
            pl.BlockSpec((1, S, 1, nH, dh), lambda b: (b, 0, 0, 0, 0)),   # Q view
            pl.BlockSpec((1, S, 1, nH, dh), lambda b: (b, 0, 1, 0, 0)),   # K view
            pl.BlockSpec((1, S, 1, nH, dh), lambda b: (b, 0, 2, 0, 0)),   # V view
            pl.BlockSpec((1, 1, S), lambda b: (b, 0, 0)),                 # mask
        ],
        out_specs=pl.BlockSpec((1, S, H), lambda b: (b, 0, 0)),           # lane-dense slab
        compiler_params=pltpu.CompilerParams(
            dimension_semantics=("parallel",),
            vmem_limit_bytes=_vmem_limit(est2, vmem_phys)),
        cost_estimate=pl.CostEstimate(
            flops=4 * B * nH * S * S * dh,
            transcendentals=B * nH * S * S,
            bytes_accessed=3 * B * S * H * 2 + B * S * 4 + B * S * H * 2),
    )(qkv5, qkv5, qkv5, mask3d)

    # Merged-head layout already: (B, S, H) is memory-identical to (M, H).
    ctx2d = ctx.reshape(M, H)
    res2d = hidden_states.reshape(M, H)                  # f32 residual stream

    # ---- 3) output dense + residual + LayerNorm ------------------------------
    wo = params["wo"].astype(bf16)
    bo = params["bo"].astype(f32).reshape(1, H)
    gamma = params["ln_gamma"].astype(f32).reshape(1, H)
    beta = params["ln_beta"].astype(f32).reshape(1, H)

    est3 = (2 * (tm_eff * H * 2 + tm_eff * H * 4 + tm_eff * H * 4)   # ctx / res / out
            + H * H * 2 + 3 * H * 4)                                 # resident W_o + vecs
    out = pl.pallas_call(
        functools.partial(self_output_kernel, eps=eps),
        out_shape=jax.ShapeDtypeStruct((M, H), hidden_states.dtype),
        grid=(n_rows,),
        in_specs=[
            pl.BlockSpec((tm_eff, H), lambda i: (i, 0)),     # context tile (bf16)
            pl.BlockSpec((tm_eff, H), lambda i: (i, 0)),     # residual tile (f32)
            _resident_spec((H, H), lambda i: (0, 0)),        # W_o resident (bf16)
            _resident_spec((1, H), lambda i: (0, 0)),        # bias
            _resident_spec((1, H), lambda i: (0, 0)),        # LN gamma
            _resident_spec((1, H), lambda i: (0, 0)),        # LN beta
        ],
        out_specs=pl.BlockSpec((tm_eff, H), lambda i: (i, 0)),
        compiler_params=pltpu.CompilerParams(
            dimension_semantics=("parallel",),
            vmem_limit_bytes=_vmem_limit(est3, vmem_phys)),
        cost_estimate=pl.CostEstimate(
            flops=2 * M * H * H,
            transcendentals=M,
            bytes_accessed=M * H * 2 + M * H * 4 + H * H * 2 + M * H * 4),
    )(ctx2d, res2d, wo, bo, gamma, beta)

    return out.reshape(B, S, H)


# ---------------------------------------------------------------------------
# Pure-JAX reference (f32 everywhere, mirrors the PyTorch module in eval mode)
# ---------------------------------------------------------------------------
def reference(hidden_states, attention_mask, params, *, num_heads, eps=1e-12):
    B, S, H = hidden_states.shape
    dh = H // num_heads

    def split(x):
        return x.reshape(B, S, num_heads, dh).transpose(0, 2, 1, 3)

    q = split(hidden_states @ params["wq"] + params["bq"])
    k = split(hidden_states @ params["wk"] + params["bk"])
    v = split(hidden_states @ params["wv"] + params["bv"])
    scores = jnp.einsum("bhqd,bhkd->bhqk", q, k) / math.sqrt(dh)
    scores = scores + attention_mask.reshape(B, 1, 1, S)
    probs = jax.nn.softmax(scores, axis=-1)
    ctx = jnp.einsum("bhqk,bhkd->bhqd", probs, v)
    ctx = ctx.transpose(0, 2, 1, 3).reshape(B, S, H)
    y = ctx @ params["wo"] + params["bo"] + hidden_states
    mean = jnp.mean(y, axis=-1, keepdims=True)
    var = jnp.mean((y - mean) ** 2, axis=-1, keepdims=True)
    return (y - mean) * jax.lax.rsqrt(var + eps) * params["ln_gamma"] + params["ln_beta"]


if __name__ == "__main__":
    B, S, H, nH = 2, 8, 32, 4
    eps = 1e-12

    key = jax.random.PRNGKey(0)
    ks = jax.random.split(key, 9)

    hidden_states = jax.random.normal(ks[0], (B, S, H), dtype=jnp.float32)

    # Additive attention mask in BERT convention (0 keep / -10000 drop);
    # last two key positions of batch 1 are masked.
    keep = jnp.ones((B, S), jnp.float32).at[1, S - 2:].set(0.0)
    attention_mask = (1.0 - keep) * -10000.0                      # [B, S]

    def init(k, shape):
        return jax.random.normal(k, shape, dtype=jnp.float32) * 0.05

    params = dict(
        wq=init(ks[1], (H, H)), bq=init(ks[2], (H,)),
        wk=init(ks[3], (H, H)), bk=init(ks[4], (H,)),
        wv=init(ks[5], (H, H)), bv=init(ks[6], (H,)),
        wo=init(ks[7], (H, H)), bo=init(ks[8], (H,)),
        ln_gamma=jnp.ones((H,), jnp.float32),
        ln_beta=jnp.zeros((H,), jnp.float32),
    )

    out = bert_attention(hidden_states, attention_mask, params,
                         num_heads=nH, eps=eps)
    out = jax.block_until_ready(out)
    assert out.shape == (B, S, H)

    ref = reference(hidden_states, attention_mask, params, num_heads=nH, eps=eps)
    max_err = float(jnp.max(jnp.abs(out - ref)))
    # bf16 MXU operands + approx reciprocal (f32 accumulation / LN / softmax)
    # -> relaxed tolerance.
    assert jnp.allclose(out, ref, atol=2e-2, rtol=2e-2), f"mismatch vs reference: {max_err}"

    print("KERNEL_OK")
</pallas_src>

<mosaic_0001>
module attributes {stable_mosaic.version = 11 : i64} {
  func.func @qkv_proj_kernel(%arg0: i32, %arg1: memref<16x32xf32, #tpu.memory_space<vmem>>, %arg2: memref<32x96xbf16, #tpu.memory_space<vmem>>, %arg3: memref<1x96xf32, #tpu.memory_space<vmem>>, %arg4: memref<16x96xbf16, #tpu.memory_space<vmem>>) attributes {dimension_semantics = [#tpu.dimension_semantics<parallel>], iteration_bounds = array<i64: 1>, scalar_prefetch = 0 : i64, scratch_operands = 0 : i64, tpu.core_type = #tpu.core_type<tc>, window_params = [{transform_indices = @transform_0, window_bounds = array<i64: 16, 32>}, {pipeline_mode = #tpu.pipeline_mode<synchronous>, transform_indices = @transform_1, window_bounds = array<i64: 32, 96>}, {pipeline_mode = #tpu.pipeline_mode<synchronous>, transform_indices = @transform_2, window_bounds = array<i64: 1, 96>}, {transform_indices = @transform_3, window_bounds = array<i64: 16, 96>}]} {
    %c0 = arith.constant 0 : index
    %c0_0 = arith.constant 0 : index
    %0 = vector.load %arg1[%c0, %c0_0] : memref<16x32xf32, #tpu.memory_space<vmem>>, vector<16x32xf32>
    %1 = arith.truncf %0 : vector<16x32xf32> to vector<16x32xbf16>
    %c0_1 = arith.constant 0 : index
    %c0_2 = arith.constant 0 : index
    %2 = vector.load %arg2[%c0_1, %c0_2] : memref<32x96xbf16, #tpu.memory_space<vmem>>, vector<32x96xbf16>
    %cst = arith.constant dense<0.000000e+00> : vector<16x96xf32>
    %3 = tpu.matmul %1, %2, %cst {dimension_numbers = #tpu.dot_dimension_numbers<[1], [0], [0], [1], [0, 0, 1, 1], [], []>} : vector<16x32xbf16>, vector<32x96xbf16>, vector<16x96xf32> -> vector<16x96xf32>
    %c0_3 = arith.constant 0 : index
    %c0_4 = arith.constant 0 : index
    %4 = vector.load %arg3[%c0_3, %c0_4] : memref<1x96xf32, #tpu.memory_space<vmem>>, vector<1x96xf32>
    %5 = vector.broadcast %4 : vector<1x96xf32> to vector<16x96xf32>
    %6 = arith.addf %3, %5 : vector<16x96xf32>
    %7 = arith.truncf %6 : vector<16x96xf32> to vector<16x96xbf16>
    %c0_5 = arith.constant 0 : index
    %c0_6 = arith.constant 0 : index
    %8 = vector.load %arg4[%c0_5, %c0_6] : memref<16x96xbf16, #tpu.memory_space<vmem>>, vector<16x96xbf16>
    tpu.vector_store %arg4[%c0_5, %c0_6], %7 {strides = array<i32>} : memref<16x96xbf16, #tpu.memory_space<vmem>>, vector<16x96xbf16>,
    return
  }
  func.func @transform_0(%arg0: i32) -> (i32, i32) {
    %c0_i32 = arith.constant 0 : i32
    %c0_i32_0 = arith.constant 0 : i32
    return %arg0, %c0_i32 : i32, i32
  }
  func.func @transform_1(%arg0: i32) -> (i32, i32) {
    %c0_i32 = arith.constant 0 : i32
    %c0_i32_0 = arith.constant 0 : i32
    %c0_i32_1 = arith.constant 0 : i32
    return %c0_i32, %c0_i32_0 : i32, i32
  }
  func.func @transform_2(%arg0: i32) -> (i32, i32) {
    %c0_i32 = arith.constant 0 : i32
    %c0_i32_0 = arith.constant 0 : i32
    %c0_i32_1 = arith.constant 0 : i32
    return %c0_i32, %c0_i32_0 : i32, i32
  }
  func.func @transform_3(%arg0: i32) -> (i32, i32) {
    %c0_i32 = arith.constant 0 : i32
    %c0_i32_0 = arith.constant 0 : i32
    return %arg0, %c0_i32 : i32, i32
  }
}

</mosaic_0001>

<bundles_post_ra>
// kernel: tpu_custom_call.1
= control target key start
LH: loop header
LB: loop body
LE: loop exit
PB: predicated region body
PF: predicated region fallthrough
CT: control target
= control target key end

     0   :  { %8 = vsyncpa [#allocation3], 0  ;;  %s320_s0 = inlined_call_operand.hbm [shape: f32[16,32], index: 0, kind: input, shape index: {}]   ;;  %s321_s1 = inlined_call_operand.hbm [shape: bf16[32,96], index: 1, kind: input, shape index: {}]   ;;  %s322_s2 = inlined_call_operand.vmem [shape: f32[1,96], index: 2, kind: input, shape index: {}]   ;;  %s323_s3 = inlined_call_operand.hbm [shape: bf16[16,96], index: 3, kind: output, shape index: {}]  }
   0x1   :  { %9 = vsyncpa [#allocation6], 0 }
   0x2   :  { %10 = vsyncpa [#allocation4], 0  ;;  %s246_s12 = smov [#allocation2]   ;;  %s174_s16 = scalar_lea.hbm %s320_s0, 256 }
   0x3   :  { %s16_s13 = sshll.u32 %s246_s12, 4  ;;  %p175_p0 = scmp.ne.s32.totalorder %s320_s0, %s174_s16  ;;  %s17_s13 = int_to_ptr.vmem [resolvable:$true] %s16_s13 }
   0x4   :  { %p178_p1 = scmp.lt.u32.totalorder %s174_s16, %s320_s0 }
   0x6   :  { %p180_p2 = pnand %p178_p1, %p175_p0 }
   0x8   :  { %183 = shalt.err (!%p180_p2)
}
   0x9   :  { %s184_s21 = scalar_lea.vmem %s17_s13, 256  ;;  %p189_p4 = scmp.lt.s32.totalorder %s17_s13, %s17_s13 }
   0xa   :  { %p185_p3 = scmp.ne.s32.totalorder %s17_s13, %s184_s21  ;;  %p190_p5 = scmp.lt.s32.totalorder %s184_s21, %s184_s21 }
   0xc   :  { %p191_p6 = por %p190_p5, %p189_p4 }
   0xe   :  { %p192_p7 = pnand %p191_p6, %p185_p3 }
  0x10   :  { %195 = shalt.err (!%p192_p7)
}
  0x11   :  { %s247_s22 = smov 128   ;;  %s248_s23 = smov 8  }
  0x12   :  { %22 = dma.hbm_to_vmem [thread:$0]  %s320_s0, 256, %s17_s13, [#allocation3], %s247_s22, %s247_s22, %s248_s23  }
  0x13   :  { %s249_s26 = smov [#allocation5]   ;;  %s196_s30 = scalar_lea.hbm %s321_s1, 256 }
  0x14   :  { %s28_s27 = sshll.u32 %s249_s26, 4  ;;  %p197_p8 = scmp.ne.s32.totalorder %s321_s1, %s196_s30  ;;  %s29_s27 = int_to_ptr.vmem [resolvable:$true] %s28_s27 }
  0x15   :  { %p200_p9 = scmp.lt.u32.totalorder %s196_s30, %s321_s1 }
  0x17   :  { %p202_p10 = pnand %p200_p9, %p197_p8 }
  0x19   :  { %205 = shalt.err (!%p202_p10)
}
  0x1a   :  { %s206_s8 = scalar_lea.vmem %s29_s27, 256  ;;  %p211_p12 = scmp.lt.s32.totalorder %s29_s27, %s29_s27 }
  0x1b   :  { %p207_p11 = scmp.ne.s32.totalorder %s29_s27, %s206_s8  ;;  %p212_p13 = scmp.lt.s32.totalorder %s206_s8, %s206_s8 }
  0x1d   :  { %p213_p0 = por %p212_p13, %p211_p12 }
  0x1f   :  { %p214_p1 = pnand %p213_p0, %p207_p11 }
  0x21   :  { %217 = shalt.err (!%p214_p1)
}
  0x22   :  { %s250_s0 = smov 64   ;;  %s251_s9 = smov 4  }
  0x23   :  { %34 = dma.hbm_to_vmem [thread:$0]  %s321_s1, 256, %s29_s27, [#allocation6], %s250_s0, %s250_s0, %s251_s9  }
  0x24   :  { %240 = dma.done.wait [#allocation3], 256  }
  0x25   :  { %241 = vsyncadd [#allocation3], 4294967040 }
  0x26   :  { %242 = dma.done.wait [#allocation6], 256  }
  0x27   :  { %243 = vsyncadd [#allocation6], 4294967040  ;;  %v252_v0 = vmov 0.0   ;;  %vm253_vm0 = vmmov 0   ;;  %v172_v1 = vld [vmem:[#allocation5] sm:$0xff]   ;;  %v173_v2 = vld [vmem:[#allocation5 + $0x8] sm:$0xff]  }
  0x28   :  { %155 = vmatprep.subr.bf16.mxu0 %v252_v0  ;;  %159 = vmatprep.mubr.msk.bf16.mxu0 %vm253_vm0, %v252_v0  ;;  %v44_v3 = vld [vmem:[#allocation2] sm:$0xff]  ;;  %v45_v4 = vld [vmem:[#allocation2 + $0x8] sm:$0xff]  ;;  %vm70_vm1 = vcmask 261120   ;;  %vm123_vm2 = vcmask 781312   ;;  %s254_s13 = smov [#allocation7]  }
  0x29   :  { %156 = vmatpush3.bf16.msra.mxu0 %v172_v1  ;;  %v46_v5 = vpack.c.bf16 %v45_v4, %v44_v3  ;;  %v144_v6 = vld [vmem:[%s322_s2] ss:$0 sm:$0xff]  ;;  %s131_s14 = sshll.u32 %s254_s13, 4  ;;  %s132_s14 = int_to_ptr.vmem [resolvable:$true] %s131_s14 }
  0x2a   :  { %157 = vmatprep.subr.bf16.mxu0 %v252_v0  ;;  %s218_s15 = scalar_lea.vmem %s132_s14, 128  ;;  %p223_p3 = scmp.lt.s32.totalorder %s132_s14, %s132_s14 }
  0x2b   :  { %p219_p2 = scmp.ne.s32.totalorder %s132_s14, %s218_s15  ;;  %p224_p4 = scmp.lt.s32.totalorder %s218_s15, %s218_s15 }
  0x2d   :  { %158 = vmatpush3.bf16.msra.mxu0 %v173_v2  ;;  %p225_p5 = por %p224_p4, %p223_p3 }
  0x2f   :  { %p226_p6 = pnand %p225_p5, %p219_p2 }
  0x30   :  { %160 = vmatmul.mubr.msk.bf16.vlgmr.msra.gmra.mrb[0].mxu0 %vm70_vm1, %v46_v5 }
 0x103   :  { %v108_v7 = vpop.f32.mrb[0].mxu0 }
 0x104   :  { %v109_v8 = vadd.f32 %v144_v6, %v108_v7  ;;  %v161_v9 = vpop.f32.mrb[1].mxu0 }
 0x105   :  { %v111_v10 = vpop.f32.mrb[2].mxu0 }
 0x106   :  { %v150_v11 = vpack.c.bf16 %v109_v8, %v109_v8  ;;  %v112_v12 = vadd.f32 %v144_v6, %v111_v10  ;;  %v162_v13 = vpop.f32.mrb[3].mxu0 }
 0x108   :  { %v151_v14 = vpack.c.bf16 %v112_v12, %v112_v12  ;;  %124 = vst.msk [vmem:[#allocation7] sm:$0xf] %vm123_vm2, %v150_v11 }
 0x10a   :  { %125 = vst.msk [vmem:[#allocation7 + $0x4] sm:$0xf] %vm123_vm2, %v151_v14 }
 0x10b   :  { %229 = shalt.err (!%p226_p6)
}
 0x10c   :  { %s230_s17 = scalar_lea.hbm %s323_s3, 128 }
 0x10d   :  { %p231_p7 = scmp.ne.s32.totalorder %s323_s3, %s230_s17  ;;  %p234_p8 = scmp.lt.u32.totalorder %s230_s17, %s323_s3 }
 0x10f   :  { %p236_p9 = pnand %p234_p8, %p231_p7 }
 0x111   :  { %239 = shalt.err (!%p236_p9)
}
 0x112   :  { %137 = dma.vmem_to_hbm [thread:$0]  %s132_s14, 128, %s323_s3, [#allocation4], %s250_s0, %s250_s0, %s251_s9  }
 0x113   :  { %244 = dma.done.wait [#allocation4], 128  }
 0x114   :  { %245 = vsyncadd [#allocation4], 4294967168 }
 0x115   :  { %141 = vsyncpa [#allocation3], 1 }
 0x116   :  { %142 = vsyncpa [#allocation6], 1 }
 0x117   :  { %143 = vsyncpa [#allocation4], 1 }

</bundles_post_ra>
